<compile_context>
chip_gen: v7x
topology: tpu7x:2x2x1
jax: 0.10.0
libtpu: 0.0.40
codegen_flags: <defaults>
</compile_context>

<pallas_src>
import jax
import jax.numpy as jnp
import numpy as np
from jax.experimental import pallas as pl
from jax.experimental.pallas import tpu as pltpu


def _maxpool_kernel(x_ref, o_ref):
    # x_ref: (k, RT, OT)  ->  o_ref: (RT, OT)
    k = x_ref.shape[0]                 # static
    acc = x_ref[0]
    for j in range(1, k):              # static unroll: k-1 VPU maximums
        acc = jnp.maximum(acc, x_ref[j])
    o_ref[...] = acc


def _choose_tiles(rows, out_dim, k, itemsize):
    """Pick (rows_tile, out_tile): (sublane, lane)-legal and VMEM-friendly."""
    lane_q = 128
    sub_q = max(8, 32 // itemsize)     # 8 for f32, 16 for bf16, 32 for int8
    ot = out_dim if out_dim <= 4 * lane_q else 4 * lane_q   # <= 512 lanes/step
    rt = rows if rows <= 256 else 256
    # Keep double-buffered (input + output) blocks within a few MiB (v7x budget).
    budget = 6 * 1024 * 1024

    def footprint(rt_, ot_):
        return 2 * (k + 1) * rt_ * ot_ * itemsize

    while rt % (2 * sub_q) == 0 and rt > sub_q and footprint(rt, ot) > budget:
        rt //= 2
    while ot % (2 * lane_q) == 0 and ot > lane_q and footprint(rt, ot) > budget:
        ot //= 2
    return rt, ot


def my_max_pool1d_pad_same(x, kernel_size):
    """x: (N, C, L). Returns (N, C, out_dim), matching the PyTorch module."""
    N, C, L = x.shape
    k = int(kernel_size)
    stride = k

    out_dim = (L + stride - 1) // stride
    if out_dim % 2 != 0:
        out_dim += 1
    p = max(0, (out_dim - 1) * stride + k - L)
    pad_left = p // 2
    pad_right = p - pad_left

    rows = N * C
    itemsize = jnp.dtype(x.dtype).itemsize

    # Constant-zero pad (exactly F.pad(..., 'constant', 0)) and de-interleave
    # the non-overlapping windows so out_dim lands on the 128-lane axis:
    #   xT[j, r, o] = x_pad[r, o*k + j],  shape (k, rows, out_dim).
    # pad + reshape + transpose fuses into one XLA op feeding the pallas_call.
    # TODO(synk): fold this de-interleave into the kernel's input DMA (stride-k
    # lane gather) to remove the one remaining extra HBM round-trip.
    x_pad = jnp.pad(x.reshape(rows, L), ((0, 0), (pad_left, pad_right)),
                    mode="constant", constant_values=0)
    xT = x_pad.reshape(rows, out_dim, k).transpose(2, 0, 1)

    rt, ot = _choose_tiles(rows, out_dim, k, itemsize)
    grid = (pl.cdiv(rows, rt), pl.cdiv(out_dim, ot))

    out = pl.pallas_call(
        _maxpool_kernel,
        out_shape=jax.ShapeDtypeStruct((rows, out_dim), x.dtype),
        grid=grid,
        in_specs=[pl.BlockSpec((k, rt, ot), lambda ri, oi: (0, ri, oi))],
        out_specs=pl.BlockSpec((rt, ot), lambda ri, oi: (ri, oi)),
        compiler_params=pltpu.CompilerParams(
            dimension_semantics=("parallel", "parallel"),
            vmem_limit_bytes=32 * 1024 * 1024,
        ),
        cost_estimate=pl.CostEstimate(
            flops=rows * out_dim * max(k - 1, 1),
            transcendentals=0,
            bytes_accessed=(k + 1) * rows * out_dim * itemsize,
        ),
    )(xT)

    return out.reshape(N, C, out_dim)


def _reference(x, kernel_size):
    # Pure-numpy reference reproducing the PyTorch forward.
    x = np.asarray(x)
    N, C, L = x.shape
    stride = kernel_size
    out_dim = (L + stride - 1) // stride
    if out_dim % 2 != 0:
        out_dim += 1
    p = max(0, (out_dim - 1) * stride + kernel_size - L)
    pad_left = p // 2
    pad_right = p - pad_left
    xp = np.pad(x, ((0, 0), (0, 0), (pad_left, pad_right)),
                mode="constant", constant_values=0)
    return xp.reshape(N, C, out_dim, kernel_size).max(axis=-1)


if __name__ == "__main__":
    key = jax.random.PRNGKey(0)
    fn = jax.jit(my_max_pool1d_pad_same, static_argnums=1)

    cases = [
        ((2, 4, 16), 3, jnp.float32),      # module example sizes
        ((2, 4, 25), 5, jnp.float32),      # odd->+1 branch, asymmetric pad
        ((8, 40, 1000), 3, jnp.bfloat16),  # rows > 256 -> partial row tiles
    ]
    for shape, ksize, dtype in cases:
        key, sub = jax.random.split(key)
        x = jax.random.normal(sub, shape, dtype=dtype)
        y = jax.block_until_ready(fn(x, ksize))
        ref = _reference(np.asarray(jnp.asarray(x, jnp.float32)), ksize)
        np.testing.assert_allclose(np.asarray(y, dtype=np.float32), ref,
                                   rtol=1e-6, atol=1e-6)

    print("KERNEL_OK")
</pallas_src>

<mosaic_0001>
module attributes {stable_mosaic.version = 11 : i64} {
  func.func @_maxpool_kernel(%arg0: i32, %arg1: i32, %arg2: memref<3x8x6xf32, #tpu.memory_space<vmem>>, %arg3: memref<8x6xf32, #tpu.memory_space<vmem>>) attributes {dimension_semantics = [#tpu.dimension_semantics<parallel>, #tpu.dimension_semantics<parallel>], iteration_bounds = array<i64: 1, 1>, scalar_prefetch = 0 : i64, scratch_operands = 0 : i64, tpu.core_type = #tpu.core_type<tc>, window_params = [{transform_indices = @transform_0, window_bounds = array<i64: 3, 8, 6>}, {transform_indices = @transform_1, window_bounds = array<i64: 8, 6>}]} {
    %c0 = arith.constant 0 : index
    %c0_0 = arith.constant 0 : index
    %c0_1 = arith.constant 0 : index
    %0 = vector.load %arg2[%c0, %c0_0, %c0_1] : memref<3x8x6xf32, #tpu.memory_space<vmem>>, vector<1x8x6xf32>
    %1 = vector.shape_cast %0 : vector<1x8x6xf32> to vector<8x6xf32>
    %c1 = arith.constant 1 : index
    %c0_2 = arith.constant 0 : index
    %c0_3 = arith.constant 0 : index
    %2 = vector.load %arg2[%c1, %c0_2, %c0_3] : memref<3x8x6xf32, #tpu.memory_space<vmem>>, vector<1x8x6xf32>
    %3 = vector.shape_cast %2 : vector<1x8x6xf32> to vector<8x6xf32>
    %4 = arith.maximumf %1, %3 : vector<8x6xf32>
    %c2 = arith.constant 2 : index
    %c0_4 = arith.constant 0 : index
    %c0_5 = arith.constant 0 : index
    %5 = vector.load %arg2[%c2, %c0_4, %c0_5] : memref<3x8x6xf32, #tpu.memory_space<vmem>>, vector<1x8x6xf32>
    %6 = vector.shape_cast %5 : vector<1x8x6xf32> to vector<8x6xf32>
    %7 = arith.maximumf %4, %6 : vector<8x6xf32>
    %c0_6 = arith.constant 0 : index
    %c0_7 = arith.constant 0 : index
    %8 = vector.load %arg3[%c0_6, %c0_7] : memref<8x6xf32, #tpu.memory_space<vmem>>, vector<8x6xf32>
    tpu.vector_store %arg3[%c0_6, %c0_7], %7 {strides = array<i32>} : memref<8x6xf32, #tpu.memory_space<vmem>>, vector<8x6xf32>,
    return
  }
  func.func @transform_0(%arg0: i32, %arg1: i32) -> (i32, i32, i32) {
    %c0_i32 = arith.constant 0 : i32
    %c0_i32_0 = arith.constant 0 : i32
    return %c0_i32, %arg0, %arg1 : i32, i32, i32
  }
  func.func @transform_1(%arg0: i32, %arg1: i32) -> (i32, i32) {
    %c0_i32 = arith.constant 0 : i32
    return %arg0, %arg1 : i32, i32
  }
}

</mosaic_0001>

<bundles_post_ra>
// kernel: my_max_pool1d_pad_same.1
= control target key start
LH: loop header
LB: loop body
LE: loop exit
PB: predicated region body
PF: predicated region fallthrough
CT: control target
= control target key end

     0   :  { %s91_s0 = inlined_call_operand.vmem [shape: f32[3,8,6], index: 0, kind: input, shape index: {}]   ;;  %s92_s1 = inlined_call_operand.hbm [shape: f32[8,6], index: 1, kind: output, shape index: {}]  }
   0x1   :  { %v9_v0 = vld [vmem:[%s91_s0] sm:$0xff]  ;;  %v32_v1 = vld [vmem:[%s91_s0 + $0x8] sm:$0xff]  ;;  %v33_v2 = vld [vmem:[%s91_s0 + $0x10] sm:$0xff] }
   0x2   :  { %v12_v3 = vmax.f32 %v9_v0, %v32_v1 }
   0x3   :  { %6 = vsyncpa [#allocation3], 0  ;;  %s59_s12 = smov [#allocation2]   ;;  %vm16_vm0 = vcmask 48128  }
   0x4   :  { %s24_s13 = sshll.u32 %s59_s12, 4  ;;  %v15_v4 = vmax.f32 %v12_v3, %v33_v2  ;;  %s25_s13 = int_to_ptr.vmem [resolvable:$true] %s24_s13 }
   0x5   :  { %s35_s14 = scalar_lea.vmem %s25_s13, 128  ;;  %p40_p1 = scmp.lt.s32.totalorder %s25_s13, %s25_s13 }
   0x6   :  { %17 = vst.msk [vmem:[#allocation2] sm:$0xff] %vm16_vm0, %v15_v4  ;;  %p36_p0 = scmp.ne.s32.totalorder %s25_s13, %s35_s14  ;;  %p41_p2 = scmp.lt.s32.totalorder %s35_s14, %s35_s14 }
   0x8   :  { %p42_p3 = por %p41_p2, %p40_p1 }
   0xa   :  { %p43_p4 = pnand %p42_p3, %p36_p0 }
   0xc   :  { %46 = shalt.err (!%p43_p4)
}
   0xd   :  { %s47_s17 = scalar_lea.hbm %s92_s1, 128 }
   0xe   :  { %p48_p5 = scmp.ne.s32.totalorder %s92_s1, %s47_s17  ;;  %p51_p6 = scmp.lt.u32.totalorder %s47_s17, %s92_s1 }
  0x10   :  { %p53_p7 = pnand %p51_p6, %p48_p5 }
  0x12   :  { %56 = shalt.err (!%p53_p7)
}
  0x13   :  { %27 = dma.vmem_to_hbm [thread:$0]  %s25_s13, 128, %s92_s1, [#allocation3]  }
  0x14   :  { %57 = dma.done.wait [#allocation3], 128  }
  0x15   :  { %58 = vsyncadd [#allocation3], 4294967168 }
  0x16   :  { %31 = vsyncpa [#allocation3], 1 }

</bundles_post_ra>
